<compile_context>
chip_gen: v7x
topology: tpu7x:2x2x1
jax: 0.10.0
libtpu: 0.0.40
codegen_flags: <defaults>
</compile_context>

<pallas_src>
import jax
import jax.numpy as jnp
from jax.experimental import pallas as pl
from jax.experimental.pallas import tpu as pltpu


def _triples_distances_kernel(pos_ref, posi_ref, nbrj_ref, nbrk_ref, out_ref):
    # pos_ref  : (1, 3, At_pad)   float32  coordinate-major positions
    # posi_ref : (1, 3, TILE_NT)  float32  center-atom positions repeated per triple
    # nbr*_ref : (1, 1, TILE_NT)  int32    flattened neighbor indices (this NT tile)
    # out_ref  : (1, 3, TILE_NT)  float32  rows = (r_ij, r_ik, r_jk)
    posT = pos_ref[0]           # (3, At_pad)
    pos_i = posi_ref[0]         # (3, NTt)
    nbr_j = nbrj_ref[0]         # (1, NTt)
    nbr_k = nbrk_ref[0]         # (1, NTt)

    At = posT.shape[1]
    NTt = nbr_j.shape[1]

    # one-hot selection matrices (At, NTt): column n selects the atom row for triple n
    atom_ids = jax.lax.broadcasted_iota(jnp.int32, (At, NTt), 0)
    oh_j = (atom_ids == nbr_j).astype(jnp.float32)
    oh_k = (atom_ids == nbr_k).astype(jnp.float32)

    # gather via MXU matmul: (3, At) @ (At, NTt) -> (3, NTt)
    pos_j = jnp.dot(posT, oh_j, preferred_element_type=jnp.float32)
    pos_k = jnp.dot(posT, oh_k, preferred_element_type=jnp.float32)

    d_ij = pos_j - pos_i
    d_ik = pos_k - pos_i
    d_jk = d_ij - d_ik          # == pos_j - pos_k, no third gather needed

    eps = jnp.float32(1e-9)
    out_ref[0, 0:1, :] = jnp.sqrt(jnp.sum(d_ij * d_ij, axis=0, keepdims=True)) + eps
    out_ref[0, 1:2, :] = jnp.sqrt(jnp.sum(d_ik * d_ik, axis=0, keepdims=True)) + eps
    out_ref[0, 2:3, :] = jnp.sqrt(jnp.sum(d_jk * d_jk, axis=0, keepdims=True)) + eps


def triples_distances(positions, neighbors_j, neighbors_k,
                      offset_idx_j=None, offset_idx_k=None,
                      cell=None, cell_offsets=None):
    """Pallas implementation of TriplesDistances.forward (cell=None path)."""
    if cell is not None:
        # TODO(synk): PBC offsets not implemented in the Pallas kernel.
        raise NotImplementedError("PBC (cell) path not implemented")

    B, At, _ = positions.shape
    T = neighbors_j.shape[2]
    NT = At * T

    # --- padding / tiling choices -------------------------------------------
    LANE = 128
    MAX_TILE_NT = 2048                      # keeps At x TILE_NT one-hots small in VMEM
    if NT <= MAX_TILE_NT:
        NT_pad = ((NT + LANE - 1) // LANE) * LANE
        tile_nt = NT_pad
    else:
        tile_nt = MAX_TILE_NT
        NT_pad = ((NT + tile_nt - 1) // tile_nt) * tile_nt
    At_pad = ((At + 7) // 8) * 8

    # --- coordinate-major, lane-dense layouts -------------------------------
    posc = jnp.transpose(positions.astype(jnp.float32), (0, 2, 1))      # (B, 3, At)
    posT = jnp.pad(posc, ((0, 0), (0, 0), (0, At_pad - At)))            # (B, 3, At_pad)

    # center positions repeated T times along the flattened triple axis
    pos_i_flat = jnp.repeat(posc, T, axis=-1)                           # (B, 3, NT)
    pos_i_flat = jnp.pad(pos_i_flat, ((0, 0), (0, 0), (0, NT_pad - NT)))

    nj = neighbors_j.astype(jnp.int32).reshape(B, 1, NT)
    nk = neighbors_k.astype(jnp.int32).reshape(B, 1, NT)
    nj = jnp.pad(nj, ((0, 0), (0, 0), (0, NT_pad - NT)))                # pad with atom 0 (valid)
    nk = jnp.pad(nk, ((0, 0), (0, 0), (0, NT_pad - NT)))

    out = pl.pallas_call(
        _triples_distances_kernel,
        out_shape=jax.ShapeDtypeStruct((B, 3, NT_pad), jnp.float32),
        grid_spec=pltpu.PrefetchScalarGridSpec(
            num_scalar_prefetch=0,
            grid=(B, NT_pad // tile_nt),
            in_specs=[
                pl.BlockSpec((1, 3, At_pad), lambda b, t: (b, 0, 0)),
                pl.BlockSpec((1, 3, tile_nt), lambda b, t: (b, 0, t)),
                pl.BlockSpec((1, 1, tile_nt), lambda b, t: (b, 0, t)),
                pl.BlockSpec((1, 1, tile_nt), lambda b, t: (b, 0, t)),
            ],
            out_specs=pl.BlockSpec((1, 3, tile_nt), lambda b, t: (b, 0, t)),
        ),
        compiler_params=pltpu.CompilerParams(
            dimension_semantics=("parallel", "parallel")),
    )(posT, pos_i_flat, nj, nk)

    r_ij = out[:, 0, :NT].reshape(B, At, T)
    r_ik = out[:, 1, :NT].reshape(B, At, T)
    r_jk = out[:, 2, :NT].reshape(B, At, T)
    return r_ij, r_ik, r_jk


def _reference(positions, neighbors_j, neighbors_k):
    """Pure-JAX reference mirroring the PyTorch semantics (cell=None)."""
    B = positions.shape[0]
    idx_m = jnp.arange(B)[:, None, None]
    pos_j = positions[idx_m, neighbors_j]                 # (B, At, T, 3)
    pos_k = positions[idx_m, neighbors_k]                 # (B, At, T, 3)
    R_ij = pos_j - positions[:, :, None, :]
    R_ik = pos_k - positions[:, :, None, :]
    R_jk = pos_j - pos_k
    r_ij = jnp.linalg.norm(R_ij, ord=2, axis=3) + 1e-9
    r_ik = jnp.linalg.norm(R_ik, ord=2, axis=3) + 1e-9
    r_jk = jnp.linalg.norm(R_jk, ord=2, axis=3) + 1e-9
    return r_ij, r_ik, r_jk


if __name__ == "__main__":
    key = jax.random.PRNGKey(0)
    kp, kj, kk = jax.random.split(key, 3)

    B, At, T = 2, 8, 12        # batch, atoms, triple neighbors
    positions = jax.random.normal(kp, (B, At, 3), dtype=jnp.float32)
    neighbors_j = jax.random.randint(kj, (B, At, T), 0, At, dtype=jnp.int32)
    neighbors_k = jax.random.randint(kk, (B, At, T), 0, At, dtype=jnp.int32)

    r_ij, r_ik, r_jk = triples_distances(positions, neighbors_j, neighbors_k)
    jax.block_until_ready((r_ij, r_ik, r_jk))

    ref_ij, ref_ik, ref_jk = _reference(positions, neighbors_j, neighbors_k)
    assert r_ij.shape == (B, At, T) and r_ik.shape == (B, At, T) and r_jk.shape == (B, At, T)
    assert jnp.allclose(r_ij, ref_ij, rtol=1e-5, atol=1e-5)
    assert jnp.allclose(r_ik, ref_ik, rtol=1e-5, atol=1e-5)
    assert jnp.allclose(r_jk, ref_jk, rtol=1e-5, atol=1e-5)

    print("KERNEL_OK")
</pallas_src>

<mosaic_0001>
module attributes {stable_mosaic.version = 11 : i64} {
  func.func @_triples_distances_kernel(%arg0: i32, %arg1: i32, %arg2: memref<1x3x8xf32, #tpu.memory_space<vmem>>, %arg3: memref<1x3x128xf32, #tpu.memory_space<vmem>>, %arg4: memref<1x1x128xi32, #tpu.memory_space<vmem>>, %arg5: memref<1x1x128xi32, #tpu.memory_space<vmem>>, %arg6: memref<1x3x128xf32, #tpu.memory_space<vmem>>) attributes {dimension_semantics = [#tpu.dimension_semantics<parallel>, #tpu.dimension_semantics<parallel>], iteration_bounds = array<i64: 2, 1>, scalar_prefetch = 0 : i64, scratch_operands = 0 : i64, tpu.core_type = #tpu.core_type<tc>, window_params = [{transform_indices = @transform_0, window_bounds = array<i64: 1, 3, 8>}, {transform_indices = @transform_1, window_bounds = array<i64: 1, 3, 128>}, {transform_indices = @transform_2, window_bounds = array<i64: 1, 1, 128>}, {transform_indices = @transform_3, window_bounds = array<i64: 1, 1, 128>}, {transform_indices = @transform_4, window_bounds = array<i64: 1, 3, 128>}]} {
    %c0 = arith.constant 0 : index
    %c0_0 = arith.constant 0 : index
    %c0_1 = arith.constant 0 : index
    %0 = vector.load %arg2[%c0, %c0_0, %c0_1] : memref<1x3x8xf32, #tpu.memory_space<vmem>>, vector<1x3x8xf32>
    %1 = vector.shape_cast %0 : vector<1x3x8xf32> to vector<3x8xf32>
    %c0_2 = arith.constant 0 : index
    %c0_3 = arith.constant 0 : index
    %c0_4 = arith.constant 0 : index
    %2 = vector.load %arg3[%c0_2, %c0_3, %c0_4] : memref<1x3x128xf32, #tpu.memory_space<vmem>>, vector<1x3x128xf32>
    %3 = vector.shape_cast %2 : vector<1x3x128xf32> to vector<3x128xf32>
    %c0_5 = arith.constant 0 : index
    %c0_6 = arith.constant 0 : index
    %c0_7 = arith.constant 0 : index
    %4 = vector.load %arg4[%c0_5, %c0_6, %c0_7] : memref<1x1x128xi32, #tpu.memory_space<vmem>>, vector<1x1x128xi32>
    %5 = vector.shape_cast %4 : vector<1x1x128xi32> to vector<1x128xi32>
    %c0_8 = arith.constant 0 : index
    %c0_9 = arith.constant 0 : index
    %c0_10 = arith.constant 0 : index
    %6 = vector.load %arg5[%c0_8, %c0_9, %c0_10] : memref<1x1x128xi32, #tpu.memory_space<vmem>>, vector<1x1x128xi32>
    %7 = vector.shape_cast %6 : vector<1x1x128xi32> to vector<1x128xi32>
    %8 = tpu.iota {dimensions = array<i32: 0>} : vector<8x128xi32>
    %9 = vector.broadcast %5 : vector<1x128xi32> to vector<8x128xi32>
    %10 = arith.cmpi eq, %8, %9 : vector<8x128xi32>
    %11 = arith.extui %10 : vector<8x128xi1> to vector<8x128xi32>
    %12 = arith.sitofp %11 : vector<8x128xi32> to vector<8x128xf32>
    %13 = vector.broadcast %7 : vector<1x128xi32> to vector<8x128xi32>
    %14 = arith.cmpi eq, %8, %13 : vector<8x128xi32>
    %15 = arith.extui %14 : vector<8x128xi1> to vector<8x128xi32>
    %16 = arith.sitofp %15 : vector<8x128xi32> to vector<8x128xf32>
    %cst = arith.constant dense<0.000000e+00> : vector<3x128xf32>
    %17 = tpu.matmul %1, %12, %cst {dimension_numbers = #tpu.dot_dimension_numbers<[1], [0], [0], [1], [0, 0, 1, 1], [], []>} : vector<3x8xf32>, vector<8x128xf32>, vector<3x128xf32> -> vector<3x128xf32>
    %cst_11 = arith.constant dense<0.000000e+00> : vector<3x128xf32>
    %18 = tpu.matmul %1, %16, %cst_11 {dimension_numbers = #tpu.dot_dimension_numbers<[1], [0], [0], [1], [0, 0, 1, 1], [], []>} : vector<3x8xf32>, vector<8x128xf32>, vector<3x128xf32> -> vector<3x128xf32>
    %19 = arith.subf %17, %3 : vector<3x128xf32>
    %20 = arith.subf %18, %3 : vector<3x128xf32>
    %21 = arith.subf %19, %20 : vector<3x128xf32>
    %22 = arith.mulf %19, %19 : vector<3x128xf32>
    %cst_12 = arith.constant dense<0.000000e+00> : vector<128xf32>
    %23 = vector.multi_reduction <add>, %22, %cst_12 [0] : vector<3x128xf32> to vector<128xf32>
    %24 = vector.shape_cast %23 : vector<128xf32> to vector<1x128xf32>
    %25 = math.sqrt %24 : vector<1x128xf32>
    %cst_13 = arith.constant 9.99999971E-10 : f32
    %26 = vector.broadcast %cst_13 : f32 to vector<1x128xf32>
    %27 = arith.addf %25, %26 : vector<1x128xf32>
    %c0_14 = arith.constant 0 : index
    %c0_15 = arith.constant 0 : index
    %c0_16 = arith.constant 0 : index
    %28 = vector.load %arg6[%c0_14, %c0_15, %c0_16] : memref<1x3x128xf32, #tpu.memory_space<vmem>>, vector<1x1x128xf32>
    %29 = vector.shape_cast %28 : vector<1x1x128xf32> to vector<1x128xf32>
    %30 = vector.shape_cast %27 : vector<1x128xf32> to vector<1x1x128xf32>
    tpu.vector_store %arg6[%c0_14, %c0_15, %c0_16], %30 {strides = array<i32>} : memref<1x3x128xf32, #tpu.memory_space<vmem>>, vector<1x1x128xf32>,
    %31 = arith.mulf %20, %20 : vector<3x128xf32>
    %cst_17 = arith.constant dense<0.000000e+00> : vector<128xf32>
    %32 = vector.multi_reduction <add>, %31, %cst_17 [0] : vector<3x128xf32> to vector<128xf32>
    %33 = vector.shape_cast %32 : vector<128xf32> to vector<1x128xf32>
    %34 = math.sqrt %33 : vector<1x128xf32>
    %cst_18 = arith.constant 9.99999971E-10 : f32
    %35 = vector.broadcast %cst_18 : f32 to vector<1x128xf32>
    %36 = arith.addf %34, %35 : vector<1x128xf32>
    %c0_19 = arith.constant 0 : index
    %c1 = arith.constant 1 : index
    %c0_20 = arith.constant 0 : index
    %37 = vector.load %arg6[%c0_19, %c1, %c0_20] : memref<1x3x128xf32, #tpu.memory_space<vmem>>, vector<1x1x128xf32>
    %38 = vector.shape_cast %37 : vector<1x1x128xf32> to vector<1x128xf32>
    %39 = vector.shape_cast %36 : vector<1x128xf32> to vector<1x1x128xf32>
    tpu.vector_store %arg6[%c0_19, %c1, %c0_20], %39 {strides = array<i32>} : memref<1x3x128xf32, #tpu.memory_space<vmem>>, vector<1x1x128xf32>,
    %40 = arith.mulf %21, %21 : vector<3x128xf32>
    %cst_21 = arith.constant dense<0.000000e+00> : vector<128xf32>
    %41 = vector.multi_reduction <add>, %40, %cst_21 [0] : vector<3x128xf32> to vector<128xf32>
    %42 = vector.shape_cast %41 : vector<128xf32> to vector<1x128xf32>
    %43 = math.sqrt %42 : vector<1x128xf32>
    %cst_22 = arith.constant 9.99999971E-10 : f32
    %44 = vector.broadcast %cst_22 : f32 to vector<1x128xf32>
    %45 = arith.addf %43, %44 : vector<1x128xf32>
    %c0_23 = arith.constant 0 : index
    %c2 = arith.constant 2 : index
    %c0_24 = arith.constant 0 : index
    %46 = vector.load %arg6[%c0_23, %c2, %c0_24] : memref<1x3x128xf32, #tpu.memory_space<vmem>>, vector<1x1x128xf32>
    %47 = vector.shape_cast %46 : vector<1x1x128xf32> to vector<1x128xf32>
    %48 = vector.shape_cast %45 : vector<1x128xf32> to vector<1x1x128xf32>
    tpu.vector_store %arg6[%c0_23, %c2, %c0_24], %48 {strides = array<i32>} : memref<1x3x128xf32, #tpu.memory_space<vmem>>, vector<1x1x128xf32>,
    return
  }
  func.func @transform_0(%arg0: i32, %arg1: i32) -> (i32, i32, i32) {
    %c0_i32 = arith.constant 0 : i32
    %c0_i32_0 = arith.constant 0 : i32
    %c0_i32_1 = arith.constant 0 : i32
    return %arg0, %c0_i32, %c0_i32_0 : i32, i32, i32
  }
  func.func @transform_1(%arg0: i32, %arg1: i32) -> (i32, i32, i32) {
    %c0_i32 = arith.constant 0 : i32
    %c0_i32_0 = arith.constant 0 : i32
    return %arg0, %c0_i32, %arg1 : i32, i32, i32
  }
  func.func @transform_2(%arg0: i32, %arg1: i32) -> (i32, i32, i32) {
    %c0_i32 = arith.constant 0 : i32
    %c0_i32_0 = arith.constant 0 : i32
    return %arg0, %c0_i32, %arg1 : i32, i32, i32
  }
  func.func @transform_3(%arg0: i32, %arg1: i32) -> (i32, i32, i32) {
    %c0_i32 = arith.constant 0 : i32
    %c0_i32_0 = arith.constant 0 : i32
    return %arg0, %c0_i32, %arg1 : i32, i32, i32
  }
  func.func @transform_4(%arg0: i32, %arg1: i32) -> (i32, i32, i32) {
    %c0_i32 = arith.constant 0 : i32
    %c0_i32_0 = arith.constant 0 : i32
    return %arg0, %c0_i32, %arg1 : i32, i32, i32
  }
}

</mosaic_0001>

<bundles_post_ra>
// kernel: tpu_custom_call.1
= control target key start
LH: loop header
LB: loop body
LE: loop exit
PB: predicated region body
PF: predicated region fallthrough
CT: control target
= control target key end

     0   :  { %s737_s15 = smov 0   ;;  %s739_s16 = smov 0   ;;  %s784_s0 = inlined_call_operand.vmem [shape: f32[2,3,8], index: 0, kind: input, shape index: {}]   ;;  %s785_s1 = inlined_call_operand.vmem [shape: f32[2,3,128], index: 1, kind: input, shape index: {}]   ;;  %s786_s2 = inlined_call_operand.vmem [shape: s32[2,1,128], index: 2, kind: input, shape index: {}]   ;;  %s787_s3 = inlined_call_operand.vmem [shape: s32[2,1,128], index: 3, kind: input, shape index: {}]   ;;  %s788_s4 = inlined_call_operand.vmem [shape: f32[2,3,128], index: 4, kind: output, shape index: {}]  }
   0x1   :  { %s741_s17 = smov 0  }
   0x2 LB: > { %s26_s18 = sadd.s32 1, %s703_s16  ;;  %p624_p0 = scmp.ge.s32.totalorder %s707_s17, 1  ;;  %s707_s17 = sphi %s741_s17, %s14_s17   ;;  %s703_s16 = sphi %s739_s16, %s790_s16   ;;  %s699_s15 = sphi %s737_s15, %s789_s15  }
   0x3   : > { %p28_p1 = scmp.ge.s32.totalorder %s26_s18, 2  ;;  %p215_p2 = scmp.lt.s32.totalorder %s707_s17, 3 }
   0x5   : > { %s792_s18 = smov (%p28_p1, %s26_s18), 0  ;;  %p216_p3 = pnand %p624_p0, %p215_p2 }
   0x6   : > { %p261_p4 = scmp.lt.s32.totalorder (!%p216_p3), %s699_s15, 1  ;;  %v295_v0 = vlaneseq (!%p216_p3)  ;;  %v709_v1 = vmov (!%p216_p3), 0.0   ;;  %vm710_vm0 = vmmov (!%p216_p3), 0   ;;  %vm311_vm1 = vcmask (!%p216_p3), 64512  }
   0x7   : > { %219 = sbr.rel (%p216_p3) target bundleno = 269 (0x10d), region = 36  ;;  %642 = vmatprep.subr.mxu0 (!%p216_p3), %v709_v1  ;;  %647 = vmatprep.subr.mxu1 (!%p216_p3), %v709_v1  ;;  %v711_v5 = vmov (!%p216_p3), 1.0   ;;  %vm459_vm4 = vcmask (!%p216_p3), 1042432  }
   0x8   : > { %v296_v2 = vshrl.u32 (!%p216_p3), %v295_v0, 7  ;;  %644 = vmatprep.mubr.msk.f32.mxu0 (!%p216_p3), %vm710_vm0, %v709_v1  ;;  %649 = vmatprep.mubr.msk.f32.mxu1 (!%p216_p3), %vm710_vm0, %v709_v1 }
   0xe   : > { %s794_s15 = smov (!%p261_p4, %s699_s15), 1 }
   0xf   : > { %s277_s21 = scalar_lea.vmem %s786_s2, %s794_s15  ;;  %s283_s24 = scalar_lea.vmem %s787_s3, %s794_s15 }
  0x10   : > { %v628_v3 = vld [vmem:[%s277_s21] ss:$0 sm:$0xff]  ;;  %s761_s25 = sshll.u32 %s794_s15, 2 }
  0x11   : > { %v630_v4 = vld [vmem:[%s283_s24] ss:$0 sm:$0xff]  ;;  %vm301_vm2 = vcmp.eq.s32.totalorder %v296_v2, %v628_v3  ;;  %s264_s28 = scalar_lea.vmem %s784_s0, %s761_s25  ;;  %s271_s5 = scalar_lea.vmem %s785_s1, %s761_s25 }
  0x12   : > { %vm308_vm3 = vcmp.eq.s32.totalorder %v296_v2, %v630_v4  ;;  %643 = vmatpush3.msk.msra.mxu0 %vm301_vm2, %v711_v5  ;;  %v291_v6 = vld [vmem:[%s264_s28] sm:$0x7]  ;;  %s290_s8 = scalar_lea.vmem %s788_s4, %s761_s25 }
  0x13   : > { %648 = vmatpush3.msk.msra.mxu1 %vm308_vm3, %v711_v5  ;;  %645 = vmatmul.mubr.msk.f32.vlgmr.msra.gmra.mrb[0].mxu0 %vm311_vm1, %v291_v6  ;;  %v292_v7 = vld [vmem:[%s271_s5] sm:$0x7] }
  0x14   : > { %650 = vmatmul.mubr.msk.f32.vlgmr.msra.gmra.mrb[0].mxu1 %vm311_vm1, %v291_v6 }
  0xe6   : > { %v381_v8 = vpop.f32.mrb[0].mxu0 }
  0xe7   : > { %v451_v9 = vpop.f32.mrb[0].mxu1  ;;  %v455_v10 = vsub.f32 %v381_v8, %v292_v7  ;;  %v646_v12 = vpop.f32.mrb[1].mxu0 }
  0xe8   : > { %v456_v11 = vsub.f32 %v451_v9, %v292_v7  ;;  %v651_v13 = vpop.f32.mrb[1].mxu1 }
  0xe9   : > { %v458_v14 = vmul.f32 %v455_v10, %v455_v10 }
  0xea   : > { %v457_v15 = vsub.f32 %v455_v10, %v456_v11  ;;  %v476_v16 = vmul.f32 %v456_v11, %v456_v11 }
  0xeb   : > { %v460_v17 = vsel %vm459_vm4, %v458_v14, 0.0 }
  0xec   : > { %v477_v18 = vsel %vm459_vm4, %v476_v16, 0.0  ;;  %v493_v19 = vmul.f32 %v457_v15, %v457_v15  ;;  %v461_v20 = vrot.slane %v460_v17, 4 }
  0xed   : > { %v478_v21 = vrot.slane %v477_v18, 4 }
  0xee   : > { %v494_v22 = vsel %vm459_vm4, %v493_v19, 0.0  ;;  %v462_v23 = vadd.f32 %v461_v20, %v460_v17 }
  0xef   : > { %v479_v24 = vadd.f32 %v478_v21, %v477_v18  ;;  %v495_v25 = vrot.slane %v494_v22, 4 }
  0xf0   : > { %v463_v26 = vrot.slane %v462_v23, 2 }
  0xf1   : > { %v480_v27 = vrot.slane %v479_v24, 2  ;;  %v496_v28 = vadd.f32 %v495_v25, %v494_v22 }
  0xf2   : > { %v464_v29 = vadd.f32 %v463_v26, %v462_v23 }
  0xf3   : > { %v481_v30 = vadd.f32 %v480_v27, %v479_v24  ;;  %v497_v31 = vrot.slane %v496_v28, 2 }
  0xf4   : > { %v465_v32 = vrot.slane %v464_v29, 1 }
  0xf5   : > { %v482_v33 = vrot.slane %v481_v30, 1  ;;  %v498_v34 = vadd.f32 %v497_v31, %v496_v28 }
  0xf6   : > { %v466_v35 = vadd.f32 %v465_v32, %v464_v29 }
  0xf7   : > { %v483_v36 = vadd.f32 %v482_v33, %v481_v30  ;;  %v499_v37 = vrot.slane %v498_v34, 1 }
  0xf8   : > { %679 = vrsqrt.f32 %v466_v35  ;;  %vm469_vm5 = vcmp.eq.f32.partialorder %v466_v35, inf  ;;  %v472_v42 = vand.u32 2147483648, %v466_v35  ;;  %vm471_vm6 = vcmp.eq.f32.partialorder %v466_v35, 0.0 }
  0xf9   : > { %681 = vrsqrt.f32 %v483_v36  ;;  %v500_v38 = vadd.f32 %v499_v37, %v498_v34  ;;  %vm486_vm7 = vcmp.eq.f32.partialorder %v483_v36, inf  ;;  %v489_v45 = vand.u32 2147483648, %v483_v36 }
  0xfa   : > { %vm488_vm8 = vcmp.eq.f32.partialorder %v483_v36, 0.0 }
  0xfb   : > { %683 = vrsqrt.f32 %v500_v38  ;;  %vm503_vm9 = vcmp.eq.f32.partialorder %v500_v38, inf  ;;  %v506_v53 = vand.u32 2147483648, %v500_v38  ;;  %vm505_vm10 = vcmp.eq.f32.partialorder %v500_v38, 0.0 }
 0x102   : > { %v680_v39 = vpop.eup %679 }
 0x103   : > { %v682_v40 = vpop.eup %681  ;;  %v468_v41 = vmul.f32 %v680_v39, %v466_v35 }
 0x104   : > { %v485_v43 = vmul.f32 %v682_v40, %v483_v36 }
 0x105   : > { %v470_v44 = vsel %vm469_vm5, %v466_v35, %v468_v41  ;;  %v684_v46 = vpop.eup %683 }
 0x106   : > { %v473_v47 = vsel %vm471_vm6, %v472_v42, %v470_v44  ;;  %v487_v48 = vsel %vm486_vm7, %v483_v36, %v485_v43  ;;  %v502_v51 = vmul.f32 %v684_v46, %v500_v38 }
 0x107   : > { %v474_v49 = vadd.f32 1e-09, %v473_v47  ;;  %v490_v50 = vsel %vm488_vm8, %v489_v45, %v487_v48 }
 0x108   : > { %v491_v52 = vadd.f32 1e-09, %v490_v50  ;;  %v504_v54 = vsel %vm503_vm9, %v500_v38, %v502_v51 }
 0x109   : > { %475 = vst [vmem:[%s290_s8] sm:$0x1] %v474_v49  ;;  %v507_v55 = vsel %vm505_vm10, %v506_v53, %v504_v54 }
 0x10a   : > { %492 = vst [vmem:[%s290_s8 + $0x1] sm:$0x1] %v491_v52  ;;  %v508_v56 = vadd.f32 1e-09, %v507_v55 }
 0x10c   : > { %509 = vst [vmem:[%s290_s8 + $0x2] sm:$0x1] %v508_v56 }
 0x10d PF: > { %s14_s17 = sadd.s32 1, %s707_s17   ;;  %s789_s15 = smov %s703_s16 }
 0x10e   : > { %p11_p5 = scmp.ge.s32.totalorder %s14_s17, 4   ;;  %s790_s16 = smov %s792_s18 }
 0x110   :  { %13 = sbr.rel (!%p11_p5) target bundleno = 2 (0x2), region = 75 }

</bundles_post_ra>
